<compile_context>
chip_gen: v7x
topology: tpu7x:2x2x1
jax: 0.10.0
libtpu: 0.0.40
codegen_flags: <defaults>
</compile_context>

<pallas_src>
import functools

import jax
import jax.numpy as jnp
from jax.experimental import pallas as pl
from jax.experimental.pallas import tpu as pltpu


def _simam_kernel(x_ref, o_ref, *, inv_hw, inv_n, e_lambda):
    """x_ref / o_ref: [row_tile, H*W] blocks in VMEM; one row = one (b, c)."""
    x = x_ref[...].astype(jnp.float32)
    mu = jnp.sum(x, axis=-1, keepdims=True) * inv_hw        # per-row mean
    d = x - mu
    d2 = d * d
    s = jnp.sum(d2, axis=-1, keepdims=True)                 # per-row sum of squares
    denom = 4.0 * (s * inv_n + e_lambda)                    # [row_tile, 1]
    # Exact reciprocal: per-row scalar in an HBM-bound kernel, approx buys nothing.
    y = d2 * pl.reciprocal(denom, approx=False) + 0.5
    o_ref[...] = (x * jax.nn.sigmoid(y)).astype(o_ref.dtype)


def _sublane_multiple(dtype):
    # Sub-32-bit dtypes pack along sublanes: 8 rows for f32, 16 bf16, 32 8-bit.
    return max(8, 32 // jnp.dtype(dtype).itemsize)


def _pick_row_tile(bc, hw, itemsize, sublane,
                   target_block_bytes=2 << 20, min_grid_steps=8):
    """Sublane-aligned row tile giving ~target_block_bytes of input per block,
    while keeping several grid steps (megacore + pipelining) when there is
    enough work.  A block spanning all rows (full dim) is always legal."""
    if bc <= sublane:
        return bc
    rows = max(1, target_block_bytes // max(1, hw * itemsize))
    rt = max(sublane, (rows // sublane) * sublane)
    while rt > sublane and pl.cdiv(bc, rt) < min_grid_steps:
        rt = max(sublane, ((rt // 2) // sublane) * sublane)
    if rt >= bc:
        rt = bc          # one block over all rows; full-dim block is always legal
    return rt


@functools.partial(jax.jit, static_argnames=("e_lambda",))
def simple_attention(x, e_lambda=1e-4):
    """x: [B, C, H, W] (any float dtype). Returns same shape/dtype."""
    b, c, h, w = x.shape
    bc = b * c
    hw = h * w
    n = max(hw - 1, 1)          # guard H*W == 1 (PyTorch would divide by zero)

    dtype = x.dtype
    itemsize = jnp.dtype(dtype).itemsize
    sublane = _sublane_multiple(dtype)
    row_tile = _pick_row_tile(bc, hw, itemsize, sublane)
    grid = (pl.cdiv(bc, row_tile),)   # remainder rows handled by edge-block clamping

    x2d = x.reshape(bc, hw)           # free under jit (contiguous view)

    kernel = functools.partial(
        _simam_kernel,
        inv_hw=1.0 / hw,
        inv_n=1.0 / n,
        e_lambda=float(e_lambda),
    )

    out2d = pl.pallas_call(
        kernel,
        out_shape=jax.ShapeDtypeStruct((bc, hw), dtype),
        grid_spec=pltpu.PrefetchScalarGridSpec(
            num_scalar_prefetch=0,
            grid=grid,
            in_specs=[pl.BlockSpec((row_tile, hw), lambda i: (i, 0))],
            out_specs=pl.BlockSpec((row_tile, hw), lambda i: (i, 0)),
        ),
        compiler_params=pltpu.CompilerParams(
            dimension_semantics=("parallel",),
            # Double-buffered in/out blocks (~8 MiB) plus f32 elementwise
            # temporaries; comfortably below v7x's 64 MiB physical VMEM and
            # above the 16/32 MiB scoped defaults.
            vmem_limit_bytes=48 * 1024 * 1024,
        ),
    )(x2d)

    return out2d.reshape(b, c, h, w)


def _reference(x, e_lambda=1e-4):
    h, w = x.shape[2], x.shape[3]
    n = max(h * w - 1, 1)
    mu = jnp.mean(x, axis=(2, 3), keepdims=True)
    d2 = (x - mu) ** 2
    y = d2 / (4.0 * (jnp.sum(d2, axis=(2, 3), keepdims=True) / n + e_lambda)) + 0.5
    return x * jax.nn.sigmoid(y)


if __name__ == "__main__":
    # Aligned case: hw = 256 (lane-dense), bc = 8 (one full-dim row block).
    B, C, H, W = 2, 4, 16, 16
    x = jax.random.normal(jax.random.PRNGKey(0), (B, C, H, W), dtype=jnp.float32)
    out = jax.block_until_ready(simple_attention(x, e_lambda=1e-4))
    ref = _reference(x, e_lambda=1e-4)
    assert out.shape == (B, C, H, W)
    assert jnp.allclose(out, ref, atol=1e-5, rtol=1e-5), "mismatch vs reference (aligned)"

    # Unaligned case: hw = 196 (non-multiple of 128, full-dim lane block) and
    # bc = 15 with row_tile = 8 -> exercises the remainder (edge-block) path.
    x2 = jax.random.normal(jax.random.PRNGKey(0), (3, 5, 14, 14), dtype=jnp.float32)
    out2 = jax.block_until_ready(simple_attention(x2, e_lambda=1e-4))
    ref2 = _reference(x2, e_lambda=1e-4)
    assert out2.shape == (3, 5, 14, 14)
    assert jnp.allclose(out2, ref2, atol=1e-5, rtol=1e-5), "mismatch vs reference (edge blocks)"

    print("KERNEL_OK")
</pallas_src>

<mosaic_0001>
module attributes {stable_mosaic.version = 11 : i64} {
  func.func @_simam_kernel(%arg0: i32, %arg1: memref<8x256xf32, #tpu.memory_space<vmem>>, %arg2: memref<8x256xf32, #tpu.memory_space<vmem>>) attributes {dimension_semantics = [#tpu.dimension_semantics<parallel>], iteration_bounds = array<i64: 1>, scalar_prefetch = 0 : i64, scratch_operands = 0 : i64, tpu.core_type = #tpu.core_type<tc>, window_params = [{transform_indices = @transform_0, window_bounds = array<i64: 8, 256>}, {transform_indices = @transform_1, window_bounds = array<i64: 8, 256>}]} {
    %c0 = arith.constant 0 : index
    %c0_0 = arith.constant 0 : index
    %0 = vector.load %arg1[%c0, %c0_0] : memref<8x256xf32, #tpu.memory_space<vmem>>, vector<8x256xf32>
    %cst = arith.constant dense<0.000000e+00> : vector<8xf32>
    %1 = vector.multi_reduction <add>, %0, %cst [1] : vector<8x256xf32> to vector<8xf32>
    %2 = vector.shape_cast %1 : vector<8xf32> to vector<8x1xf32>
    %cst_1 = arith.constant 3.906250e-03 : f32
    %3 = vector.broadcast %cst_1 : f32 to vector<8x1xf32>
    %4 = arith.mulf %2, %3 : vector<8x1xf32>
    %5 = vector.broadcast %4 : vector<8x1xf32> to vector<8x256xf32>
    %6 = arith.subf %0, %5 : vector<8x256xf32>
    %7 = arith.mulf %6, %6 : vector<8x256xf32>
    %cst_2 = arith.constant dense<0.000000e+00> : vector<8xf32>
    %8 = vector.multi_reduction <add>, %7, %cst_2 [1] : vector<8x256xf32> to vector<8xf32>
    %9 = vector.shape_cast %8 : vector<8xf32> to vector<8x1xf32>
    %cst_3 = arith.constant 0.00392156886 : f32
    %10 = vector.broadcast %cst_3 : f32 to vector<8x1xf32>
    %11 = arith.mulf %9, %10 : vector<8x1xf32>
    %cst_4 = arith.constant 9.99999974E-5 : f32
    %12 = vector.broadcast %cst_4 : f32 to vector<8x1xf32>
    %13 = arith.addf %11, %12 : vector<8x1xf32>
    %cst_5 = arith.constant 4.000000e+00 : f32
    %14 = vector.broadcast %cst_5 : f32 to vector<8x1xf32>
    %15 = arith.mulf %14, %13 : vector<8x1xf32>
    %16 = tpu.reciprocal %15 : vector<8x1xf32> -> vector<8x1xf32>
    %17 = vector.broadcast %16 : vector<8x1xf32> to vector<8x256xf32>
    %18 = arith.mulf %7, %17 : vector<8x256xf32>
    %cst_6 = arith.constant 5.000000e-01 : f32
    %19 = vector.broadcast %cst_6 : f32 to vector<8x256xf32>
    %20 = arith.addf %18, %19 : vector<8x256xf32>
    %21 = arith.negf %20 : vector<8x256xf32>
    %22 = math.exp %21 : vector<8x256xf32>
    %cst_7 = arith.constant 1.000000e+00 : f32
    %23 = vector.broadcast %cst_7 : f32 to vector<8x256xf32>
    %24 = arith.addf %23, %22 : vector<8x256xf32>
    %25 = arith.divf %23, %24 : vector<8x256xf32>
    %26 = arith.mulf %0, %25 : vector<8x256xf32>
    %c0_8 = arith.constant 0 : index
    %c0_9 = arith.constant 0 : index
    %27 = vector.load %arg2[%c0_8, %c0_9] : memref<8x256xf32, #tpu.memory_space<vmem>>, vector<8x256xf32>
    tpu.vector_store %arg2[%c0_8, %c0_9], %26 {strides = array<i32>} : memref<8x256xf32, #tpu.memory_space<vmem>>, vector<8x256xf32>,
    return
  }
  func.func @transform_0(%arg0: i32) -> (i32, i32) {
    %c0_i32 = arith.constant 0 : i32
    %c0_i32_0 = arith.constant 0 : i32
    return %arg0, %c0_i32 : i32, i32
  }
  func.func @transform_1(%arg0: i32) -> (i32, i32) {
    %c0_i32 = arith.constant 0 : i32
    %c0_i32_0 = arith.constant 0 : i32
    return %arg0, %c0_i32 : i32, i32
  }
}

</mosaic_0001>

<bundles_post_ra>
// kernel: simple_attention.1
= control target key start
LH: loop header
LB: loop body
LE: loop exit
PB: predicated region body
PF: predicated region fallthrough
CT: control target
= control target key end

     0   :  { %s83_s0 = inlined_call_operand.vmem [shape: f32[8,256], index: 0, kind: input, shape index: {}]   ;;  %s84_s1 = inlined_call_operand.vmem [shape: f32[8,256], index: 1, kind: output, shape index: {}]  }
   0x1   :  { %v8_v0 = vld [vmem:[%s83_s0] sm:$0xff]  ;;  %v9_v1 = vld [vmem:[%s83_s0 + $0x8] sm:$0xff] }
   0x2   :  { %v10_v2 = vadd.f32 %v9_v1, %v8_v0 }
   0x4   :  { %11 = vadd.xlane.f32.xlu0 %v10_v2 }
  0x91   :  { %v12_v3 = vpop.xlane.xlu0 %11 }
  0x92   :  { %v13_v4 = vmul.f32 0.00390625, %v12_v3 }
  0x94   :  { %v14_v5 = vsub.f32 %v8_v0, %v13_v4  ;;  %v15_v6 = vsub.f32 %v9_v1, %v13_v4 }
  0x96   :  { %v16_v7 = vmul.f32 %v14_v5, %v14_v5  ;;  %v17_v8 = vmul.f32 %v15_v6, %v15_v6 }
  0x98   :  { %v18_v9 = vadd.f32 %v17_v8, %v16_v7 }
  0x9a   :  { %19 = vadd.xlane.f32.xlu0 %v18_v9 }
 0x127   :  { %v20_v10 = vpop.xlane.xlu0 %19 }
 0x128   :  { %v21_v11 = vmul.f32 0.003921569, %v20_v10 }
 0x12a   :  { %v22_v12 = vadd.f32 0.0001, %v21_v11 }
 0x12c   :  { %v23_v13 = vmul.f32 4.0, %v22_v12 }
 0x12e   :  { %51 = vrcp.f32 %v23_v13 }
 0x138   :  { %v52_v14 = vpop.eup %51 }
 0x139   :  { %v25_v15 = vmul.f32 %v52_v14, %v16_v7  ;;  %v26_v16 = vmul.f32 %v52_v14, %v17_v8 }
 0x13b   :  { %v27_v17 = vadd.f32 0.5, %v25_v15  ;;  %v28_v18 = vadd.f32 0.5, %v26_v16 }
 0x13d   :  { %v49_v19 = vmul.f32 -1.442695, %v27_v17  ;;  %v50_v20 = vmul.f32 -1.442695, %v28_v18 }
 0x13f   :  { %53 = vpow2.f32 %v49_v19 }
 0x140   :  { %55 = vpow2.f32 %v50_v20 }
 0x149   :  { %v54_v21 = vpop.eup %53 }
 0x14a   :  { %v56_v22 = vpop.eup %55  ;;  %v35_v23 = vadd.f32 1.0, %v54_v21 }
 0x14b   :  { %v36_v24 = vadd.f32 1.0, %v56_v22 }
 0x14c   :  { %57 = vrcp.f32 %v35_v23 }
 0x14d   :  { %59 = vrcp.f32 %v36_v24 }
 0x156   :  { %v58_v25 = vpop.eup %57 }
 0x157   :  { %v60_v26 = vpop.eup %59  ;;  %v41_v27 = vmul.f32 %v58_v25, %v8_v0 }
 0x158   :  { %v42_v28 = vmul.f32 %v60_v26, %v9_v1 }
 0x159   :  { %43 = vst [vmem:[%s84_s1] sm:$0xff] %v41_v27 }
 0x15a   :  { %44 = vst [vmem:[%s84_s1 + $0x8] sm:$0xff] %v42_v28 }

</bundles_post_ra>
